<compile_context>
chip_gen: v7x
topology: tpu7x:2x2x1
jax: 0.10.0
libtpu: 0.0.40
codegen_flags: <defaults>
</compile_context>

<pallas_src>
import numpy as np
import jax
import jax.numpy as jnp
from jax.experimental import pallas as pl
from jax.experimental.pallas import tpu as pltpu

HIDDEN = 256  # fixed by the module: nn.Linear(x_dim + y_dim, 256)


def _round_up(n, m):
    return ((n + m - 1) // m) * m


def _pick_batch_tile(batch):
    """Large batch tile (per-step overhead amortization), but keep >=2 grid steps when the
    batch allows so the 'parallel' grid axis can shard across v7x's two TensorCores."""
    b8 = _round_up(batch, 8)
    if b8 <= 8:
        return 8
    if b8 <= 1024:
        return _round_up(pl.cdiv(b8, 2), 8)
    return 512


def _cvae_kernel(x_ref, y_ref, eps_ref,
                 w1x_ref, w1y_ref, b1_ref, wml_ref, bml_ref,
                 out_ref):
    """Fused CVAEnet forward for one batch tile, both branches at once.

      h   = tanh(x @ [W1x_a|W1x_s] + [y_a|y_s] @ blockdiag(W1y) + [b1_a|b1_s])   (TB, 2H)
      ml  = h @ blockdiag-packed [Wmu|Wlv] + bml     -> (TB, 4Z) = [mu_a|mu_s|lv_a|lv_s]
      z   = mu + eps * exp(0.5 * lv)                 -> (TB, 2Z) = [z_a|z_s]
      out = [z | mu | lv | 0-pad]                    one lane-dense full-width store
    """
    x = x_ref[...]          # (TB, X)      f32
    y = y_ref[...]          # (TB, 2Y)     f32, [y_acc | y_spk]
    eps = eps_ref[...]      # (TB, 2Z)     f32, [eps_acc | eps_spk]

    h = jnp.tanh(
        jnp.dot(x, w1x_ref[...], preferred_element_type=jnp.float32)
        + jnp.dot(y, w1y_ref[...], preferred_element_type=jnp.float32)
        + b1_ref[...])                                                  # (TB, 2H)

    ml = jnp.dot(h, wml_ref[...], preferred_element_type=jnp.float32) + bml_ref[...]  # (TB, 4Z)

    two_z = eps.shape[-1]
    mu = ml[:, :two_z]                      # [mu_acc | mu_spk]
    lv = ml[:, two_z:]                      # [lv_acc | lv_spk]
    z = mu + eps * jnp.exp(0.5 * lv)        # reparameterize(training=True)

    pad = out_ref.shape[-1] - (z.shape[-1] + ml.shape[-1])
    parts = [z, ml]
    if pad:
        parts.append(jnp.zeros((z.shape[0], pad), jnp.float32))
    out_ref[...] = jnp.concatenate(parts, axis=-1).astype(out_ref.dtype)


def cvae_forward(x, label_acc, label_spk, eps_acc, eps_spk, params):
    """Pallas CVAEnet forward: (z_acc, y_acc, z_spk, y_spk, (mu_acc, lv_acc, mu_spk, lv_spk))."""
    f32 = jnp.float32
    B = x.shape[0]
    x = x.reshape(B, -1).astype(f32)                   # x.view(B, -1)
    X = x.shape[1]
    H = params["w1_acc"].shape[1]
    Y = params["emb_acc"].shape[1]
    Z = params["wmu_acc"].shape[1]
    H2, Y2, Z2, Z4 = 2 * H, 2 * Y, 2 * Z, 4 * Z
    OUT_W = _round_up(6 * Z, 128)                      # lane-dense packed-output width

    def blockdiag(a, b):
        a, b = a.astype(f32), b.astype(f32)
        top = jnp.concatenate([a, jnp.zeros((a.shape[0], b.shape[1]), f32)], axis=1)
        bot = jnp.concatenate([jnp.zeros((b.shape[0], a.shape[1]), f32), b], axis=1)
        return jnp.concatenate([top, bot], axis=0)

    # Embedding lookup hoisted to the wrapper: an XLA gather on tiny class counts is free and
    # removes two padded-K one-hot GEMMs per grid step from the kernel.
    y_acc = jnp.take(params["emb_acc"].astype(f32), label_acc.astype(jnp.int32), axis=0)
    y_spk = jnp.take(params["emb_spk"].astype(f32), label_spk.astype(jnp.int32), axis=0)
    y_cat = jnp.concatenate([y_acc, y_spk], axis=1)                                   # (B, 2Y)
    eps_cat = jnp.concatenate([eps_acc.astype(f32), eps_spk.astype(f32)], axis=1)     # (B, 2Z)

    # First layer fused across branches (x is shared):  x @ (X, 2H)  and  [y_a|y_s] @ (2Y, 2H).
    w1x_cat = jnp.concatenate(
        [params["w1_acc"][:X], params["w1_spk"][:X]], axis=1).astype(f32)             # (X, 2H)
    w1y_blk = blockdiag(params["w1_acc"][X:], params["w1_spk"][X:])                   # (2Y, 2H)
    b1_cat = jnp.concatenate([params["b1_acc"], params["b1_spk"]]).astype(f32).reshape(1, H2)

    # mu & logvar projections of both branches fused into ONE (2H, 4Z) GEMM:
    # output columns are [mu_acc | mu_spk | lv_acc | lv_spk].
    wmu_blk = blockdiag(params["wmu_acc"], params["wmu_spk"])                          # (2H, 2Z)
    wlv_blk = blockdiag(params["wlv_acc"], params["wlv_spk"])                          # (2H, 2Z)
    wml = jnp.concatenate([wmu_blk, wlv_blk], axis=1)                                  # (2H, 4Z)
    bml = jnp.concatenate([params["bmu_acc"], params["bmu_spk"],
                           params["blv_acc"], params["blv_spk"]]).astype(f32).reshape(1, Z4)

    # Batch tiling: one "parallel" grid axis; weights stay resident via constant index_map.
    TB = _pick_batch_tile(B)
    B_pad = _round_up(B, TB)

    def pad_rows(a):
        return jnp.pad(a, ((0, B_pad - a.shape[0]), (0, 0)))

    x_p, y_p, eps_p = pad_rows(x), pad_rows(y_cat), pad_rows(eps_cat)

    def row_spec(c):        # batch-tiled input/output
        return pl.BlockSpec((TB, c), lambda i: (i, 0))

    def const_spec(shape):  # whole-array weight block; index never changes -> DMA'd once
        return pl.BlockSpec(shape, lambda i: (0, 0))

    in_specs = [
        row_spec(X), row_spec(Y2), row_spec(Z2),
        const_spec((X, H2)), const_spec((Y2, H2)), const_spec((1, H2)),
        const_spec((H2, Z4)), const_spec((1, Z4)),
    ]
    out_specs = row_spec(OUT_W)
    out_shape = jax.ShapeDtypeStruct((B_pad, OUT_W), f32)

    # VMEM budget guard: raise the scoped limit only when resident weights + pipelined tiles
    # actually need it (v5e's 16 MiB default is the earliest to trip).
    itemsize = 4
    weight_bytes = (X * H2 + Y2 * H2 + H2 + H2 * Z4 + Z4) * itemsize
    tile_bytes = TB * (X + Y2 + Z2 + OUT_W) * itemsize
    interm_bytes = TB * (H2 + Z4 + OUT_W) * itemsize
    needed = 2 * (weight_bytes + tile_bytes) + interm_bytes
    if needed > (16 << 20):
        compiler_params = pltpu.CompilerParams(
            dimension_semantics=("parallel",),
            vmem_limit_bytes=int(min(needed + (4 << 20), 48 << 20)))
    else:
        compiler_params = pltpu.CompilerParams(dimension_semantics=("parallel",))

    packed = pl.pallas_call(
        _cvae_kernel,
        out_shape=out_shape,
        grid_spec=pltpu.PrefetchScalarGridSpec(
            num_scalar_prefetch=0,
            grid=(B_pad // TB,),
            in_specs=in_specs,
            out_specs=out_specs,
        ),
        compiler_params=compiler_params,
    )(x_p, y_p, eps_p, w1x_cat, w1y_blk, b1_cat, wml, bml)

    packed = packed[:B]
    z_acc, z_spk = packed[:, 0:Z], packed[:, Z:Z2]
    mu_acc, mu_spk = packed[:, Z2:Z2 + Z], packed[:, Z2 + Z:Z4]
    lv_acc, lv_spk = packed[:, Z4:Z4 + Z], packed[:, Z4 + Z:Z4 + Z2]
    return z_acc, y_acc, z_spk, y_spk, (mu_acc, lv_acc, mu_spk, lv_spk)


def accent_encoder_forward(inputs, acc_labels, spk_labels, params, eps_acc, eps_spk):
    # TODO(synk): ReferenceEncoder internals are unspecified in the provided source; `inputs`
    # is treated as the reference embedding and flattened exactly like CVAEnet's x.view(B, -1).
    ref_embs = inputs.reshape(inputs.shape[0], -1)
    return cvae_forward(ref_embs, acc_labels, spk_labels, eps_acc, eps_spk, params)


def init_params(key, n_accents, n_speakers, x_dim, y_dim, z_dim, hidden=HIDDEN):
    ks = jax.random.split(key, 14)

    def xavier(k, fi, fo):
        return jax.random.normal(k, (fi, fo), jnp.float32) * float(np.sqrt(2.0 / (fi + fo)))

    def bias(k, n):  # small nonzero biases so the bias path is exercised
        return 0.01 * jax.random.normal(k, (n,), jnp.float32)

    return {
        "emb_acc": jax.random.normal(ks[0], (n_accents, y_dim), jnp.float32),
        "w1_acc": xavier(ks[1], x_dim + y_dim, hidden), "b1_acc": bias(ks[2], hidden),
        "wmu_acc": xavier(ks[3], hidden, z_dim), "bmu_acc": bias(ks[4], z_dim),
        "wlv_acc": xavier(ks[5], hidden, z_dim), "blv_acc": bias(ks[6], z_dim),
        "emb_spk": jax.random.normal(ks[7], (n_speakers, y_dim), jnp.float32),
        "w1_spk": xavier(ks[8], x_dim + y_dim, hidden), "b1_spk": bias(ks[9], hidden),
        "wmu_spk": xavier(ks[10], hidden, z_dim), "bmu_spk": bias(ks[11], z_dim),
        "wlv_spk": xavier(ks[12], hidden, z_dim), "blv_spk": bias(ks[13], z_dim),
    }


def reference_forward(inputs, acc_labels, spk_labels, params, eps_acc, eps_spk):
    """Numpy reference reproducing the PyTorch CVAEnet.forward (same eps)."""
    x = np.asarray(inputs, np.float32).reshape(inputs.shape[0], -1)
    p = {k: np.asarray(v, np.float32) for k, v in params.items()}

    def branch(lab, eps, emb, w1, b1, wmu, bmu, wlv, blv):
        y = emb[np.asarray(lab)]
        h = np.tanh(np.concatenate([x, y], axis=1) @ w1 + b1)
        mu = h @ wmu + bmu
        lv = h @ wlv + blv
        z = mu + np.asarray(eps, np.float32) * np.exp(0.5 * lv)
        return z, y, mu, lv

    za, ya, mua, lva = branch(acc_labels, eps_acc, p["emb_acc"], p["w1_acc"], p["b1_acc"],
                              p["wmu_acc"], p["bmu_acc"], p["wlv_acc"], p["blv_acc"])
    zs, ys, mus, lvs = branch(spk_labels, eps_spk, p["emb_spk"], p["w1_spk"], p["b1_spk"],
                              p["wmu_spk"], p["bmu_spk"], p["wlv_spk"], p["blv_spk"])
    return za, ya, zs, ys, (mua, lva, mus, lvs)


if __name__ == "__main__":
    key = jax.random.PRNGKey(0)
    B, T, D = 2, 4, 32                 # reference features (B, Tmax, D); x_dim = T*D = 128
    n_accents, n_speakers = 4, 8
    y_dim, z_dim = 64, 32
    x_dim = T * D

    k_in, k_p, k_la, k_ls, k_ea, k_es = jax.random.split(key, 6)
    inputs = jax.random.normal(k_in, (B, T, D), dtype=jnp.float32)
    acc_labels = jax.random.randint(k_la, (B,), 0, n_accents, dtype=jnp.int32)
    spk_labels = jax.random.randint(k_ls, (B,), 0, n_speakers, dtype=jnp.int32)
    params = init_params(k_p, n_accents, n_speakers, x_dim, y_dim, z_dim)
    # reparameterize(training=True) noise, drawn once so the kernel and reference match.
    eps_acc = jax.random.normal(k_ea, (B, z_dim), dtype=jnp.float32)
    eps_spk = jax.random.normal(k_es, (B, z_dim), dtype=jnp.float32)

    out = accent_encoder_forward(inputs, acc_labels, spk_labels, params, eps_acc, eps_spk)
    out = jax.block_until_ready(out)
    z_acc, y_acc, z_spk, y_spk, (mu_acc, lv_acc, mu_spk, lv_spk) = out

    ref = reference_forward(inputs, acc_labels, spk_labels, params, eps_acc, eps_spk)
    rz_acc, ry_acc, rz_spk, ry_spk, (rmu_acc, rlv_acc, rmu_spk, rlv_spk) = ref

    for got, want in [(z_acc, rz_acc), (y_acc, ry_acc), (z_spk, rz_spk), (y_spk, ry_spk),
                      (mu_acc, rmu_acc), (lv_acc, rlv_acc), (mu_spk, rmu_spk), (lv_spk, rlv_spk)]:
        assert got.shape == want.shape, (got.shape, want.shape)
        np.testing.assert_allclose(np.asarray(got), want, rtol=2e-3, atol=2e-3)
    print("KERNEL_OK")
</pallas_src>

<mosaic_0001>
module attributes {stable_mosaic.version = 11 : i64} {
  func.func @_cvae_kernel(%arg0: i32, %arg1: memref<8x128xf32, #tpu.memory_space<vmem>>, %arg2: memref<8x128xf32, #tpu.memory_space<vmem>>, %arg3: memref<8x64xf32, #tpu.memory_space<vmem>>, %arg4: memref<128x512xf32, #tpu.memory_space<vmem>>, %arg5: memref<128x512xf32, #tpu.memory_space<vmem>>, %arg6: memref<1x512xf32, #tpu.memory_space<vmem>>, %arg7: memref<512x128xf32, #tpu.memory_space<vmem>>, %arg8: memref<1x128xf32, #tpu.memory_space<vmem>>, %arg9: memref<8x256xf32, #tpu.memory_space<vmem>>) attributes {dimension_semantics = [#tpu.dimension_semantics<parallel>], iteration_bounds = array<i64: 1>, scalar_prefetch = 0 : i64, scratch_operands = 0 : i64, tpu.core_type = #tpu.core_type<tc>, window_params = [{transform_indices = @transform_0, window_bounds = array<i64: 8, 128>}, {transform_indices = @transform_1, window_bounds = array<i64: 8, 128>}, {transform_indices = @transform_2, window_bounds = array<i64: 8, 64>}, {pipeline_mode = #tpu.pipeline_mode<synchronous>, transform_indices = @transform_3, window_bounds = array<i64: 128, 512>}, {pipeline_mode = #tpu.pipeline_mode<synchronous>, transform_indices = @transform_4, window_bounds = array<i64: 128, 512>}, {pipeline_mode = #tpu.pipeline_mode<synchronous>, transform_indices = @transform_5, window_bounds = array<i64: 1, 512>}, {pipeline_mode = #tpu.pipeline_mode<synchronous>, transform_indices = @transform_6, window_bounds = array<i64: 512, 128>}, {pipeline_mode = #tpu.pipeline_mode<synchronous>, transform_indices = @transform_7, window_bounds = array<i64: 1, 128>}, {transform_indices = @transform_8, window_bounds = array<i64: 8, 256>}]} {
    %c0 = arith.constant 0 : index
    %c0_0 = arith.constant 0 : index
    %0 = vector.load %arg1[%c0, %c0_0] : memref<8x128xf32, #tpu.memory_space<vmem>>, vector<8x128xf32>
    %c0_1 = arith.constant 0 : index
    %c0_2 = arith.constant 0 : index
    %1 = vector.load %arg2[%c0_1, %c0_2] : memref<8x128xf32, #tpu.memory_space<vmem>>, vector<8x128xf32>
    %c0_3 = arith.constant 0 : index
    %c0_4 = arith.constant 0 : index
    %2 = vector.load %arg3[%c0_3, %c0_4] : memref<8x64xf32, #tpu.memory_space<vmem>>, vector<8x64xf32>
    %c0_5 = arith.constant 0 : index
    %c0_6 = arith.constant 0 : index
    %3 = vector.load %arg4[%c0_5, %c0_6] : memref<128x512xf32, #tpu.memory_space<vmem>>, vector<128x512xf32>
    %cst = arith.constant dense<0.000000e+00> : vector<8x512xf32>
    %4 = tpu.matmul %0, %3, %cst {dimension_numbers = #tpu.dot_dimension_numbers<[1], [0], [0], [1], [0, 0, 1, 1], [], []>} : vector<8x128xf32>, vector<128x512xf32>, vector<8x512xf32> -> vector<8x512xf32>
    %c0_7 = arith.constant 0 : index
    %c0_8 = arith.constant 0 : index
    %5 = vector.load %arg5[%c0_7, %c0_8] : memref<128x512xf32, #tpu.memory_space<vmem>>, vector<128x512xf32>
    %cst_9 = arith.constant dense<0.000000e+00> : vector<8x512xf32>
    %6 = tpu.matmul %1, %5, %cst_9 {dimension_numbers = #tpu.dot_dimension_numbers<[1], [0], [0], [1], [0, 0, 1, 1], [], []>} : vector<8x128xf32>, vector<128x512xf32>, vector<8x512xf32> -> vector<8x512xf32>
    %7 = arith.addf %4, %6 : vector<8x512xf32>
    %c0_10 = arith.constant 0 : index
    %c0_11 = arith.constant 0 : index
    %8 = vector.load %arg6[%c0_10, %c0_11] : memref<1x512xf32, #tpu.memory_space<vmem>>, vector<1x512xf32>
    %9 = vector.broadcast %8 : vector<1x512xf32> to vector<8x512xf32>
    %10 = arith.addf %7, %9 : vector<8x512xf32>
    %11 = math.tanh %10 : vector<8x512xf32>
    %c0_12 = arith.constant 0 : index
    %c0_13 = arith.constant 0 : index
    %12 = vector.load %arg7[%c0_12, %c0_13] : memref<512x128xf32, #tpu.memory_space<vmem>>, vector<512x128xf32>
    %cst_14 = arith.constant dense<0.000000e+00> : vector<8x128xf32>
    %13 = tpu.matmul %11, %12, %cst_14 {dimension_numbers = #tpu.dot_dimension_numbers<[1], [0], [0], [1], [0, 0, 1, 1], [], []>} : vector<8x512xf32>, vector<512x128xf32>, vector<8x128xf32> -> vector<8x128xf32>
    %c0_15 = arith.constant 0 : index
    %c0_16 = arith.constant 0 : index
    %14 = vector.load %arg8[%c0_15, %c0_16] : memref<1x128xf32, #tpu.memory_space<vmem>>, vector<1x128xf32>
    %15 = vector.broadcast %14 : vector<1x128xf32> to vector<8x128xf32>
    %16 = arith.addf %13, %15 : vector<8x128xf32>
    %17 = vector.extract_strided_slice %16 {offsets = [0, 0], sizes = [8, 64], strides = [1, 1]} : vector<8x128xf32> to vector<8x64xf32>
    %18 = vector.extract_strided_slice %16 {offsets = [0, 64], sizes = [8, 64], strides = [1, 1]} : vector<8x128xf32> to vector<8x64xf32>
    %cst_17 = arith.constant 5.000000e-01 : f32
    %19 = vector.broadcast %cst_17 : f32 to vector<8x64xf32>
    %20 = arith.mulf %19, %18 : vector<8x64xf32>
    %21 = math.exp %20 : vector<8x64xf32>
    %22 = arith.mulf %2, %21 : vector<8x64xf32>
    %23 = arith.addf %17, %22 : vector<8x64xf32>
    %cst_18 = arith.constant 0.000000e+00 : f32
    %24 = vector.broadcast %cst_18 : f32 to vector<8x64xf32>
    %25 = tpu.concatenate %23, %16, %24 in 1 : vector<8x64xf32>, vector<8x128xf32>, vector<8x64xf32> -> vector<8x256xf32>
    %c0_19 = arith.constant 0 : index
    %c0_20 = arith.constant 0 : index
    %26 = vector.load %arg9[%c0_19, %c0_20] : memref<8x256xf32, #tpu.memory_space<vmem>>, vector<8x256xf32>
    tpu.vector_store %arg9[%c0_19, %c0_20], %25 {strides = array<i32>} : memref<8x256xf32, #tpu.memory_space<vmem>>, vector<8x256xf32>,
    return
  }
  func.func @transform_0(%arg0: i32) -> (i32, i32) {
    %c0_i32 = arith.constant 0 : i32
    %c0_i32_0 = arith.constant 0 : i32
    return %arg0, %c0_i32 : i32, i32
  }
  func.func @transform_1(%arg0: i32) -> (i32, i32) {
    %c0_i32 = arith.constant 0 : i32
    %c0_i32_0 = arith.constant 0 : i32
    return %arg0, %c0_i32 : i32, i32
  }
  func.func @transform_2(%arg0: i32) -> (i32, i32) {
    %c0_i32 = arith.constant 0 : i32
    %c0_i32_0 = arith.constant 0 : i32
    return %arg0, %c0_i32 : i32, i32
  }
  func.func @transform_3(%arg0: i32) -> (i32, i32) {
    %c0_i32 = arith.constant 0 : i32
    %c0_i32_0 = arith.constant 0 : i32
    %c0_i32_1 = arith.constant 0 : i32
    return %c0_i32, %c0_i32_0 : i32, i32
  }
  func.func @transform_4(%arg0: i32) -> (i32, i32) {
    %c0_i32 = arith.constant 0 : i32
    %c0_i32_0 = arith.constant 0 : i32
    %c0_i32_1 = arith.constant 0 : i32
    return %c0_i32, %c0_i32_0 : i32, i32
  }
  func.func @transform_5(%arg0: i32) -> (i32, i32) {
    %c0_i32 = arith.constant 0 : i32
    %c0_i32_0 = arith.constant 0 : i32
    %c0_i32_1 = arith.constant 0 : i32
    return %c0_i32, %c0_i32_0 : i32, i32
  }
  func.func @transform_6(%arg0: i32) -> (i32, i32) {
    %c0_i32 = arith.constant 0 : i32
    %c0_i32_0 = arith.constant 0 : i32
    %c0_i32_1 = arith.constant 0 : i32
    return %c0_i32, %c0_i32_0 : i32, i32
  }
  func.func @transform_7(%arg0: i32) -> (i32, i32) {
    %c0_i32 = arith.constant 0 : i32
    %c0_i32_0 = arith.constant 0 : i32
    %c0_i32_1 = arith.constant 0 : i32
    return %c0_i32, %c0_i32_0 : i32, i32
  }
  func.func @transform_8(%arg0: i32) -> (i32, i32) {
    %c0_i32 = arith.constant 0 : i32
    %c0_i32_0 = arith.constant 0 : i32
    return %arg0, %c0_i32 : i32, i32
  }
}

</mosaic_0001>

<bundles_post_ra>
// kernel: tpu_custom_call.1
= control target key start
LH: loop header
LB: loop body
LE: loop exit
PB: predicated region body
PF: predicated region fallthrough
CT: control target
= control target key end

     0   :  { %13 = vsyncpa [#allocation3], 0  ;;  %s1424_s0 = inlined_call_operand.hbm [shape: f32[8,128], index: 0, kind: input, shape index: {}]   ;;  %s1425_s1 = inlined_call_operand.hbm [shape: f32[8,128], index: 1, kind: input, shape index: {}]   ;;  %s1426_s2 = inlined_call_operand.hbm [shape: f32[8,64], index: 2, kind: input, shape index: {}]   ;;  %s1427_s3 = inlined_call_operand.hbm [shape: f32[128,512], index: 3, kind: input, shape index: {}]   ;;  %s1428_s4 = inlined_call_operand.hbm [shape: f32[128,512], index: 4, kind: input, shape index: {}]   ;;  %s1429_s5 = inlined_call_operand.vmem [shape: f32[1,512], index: 5, kind: input, shape index: {}]   ;;  %s1430_s6 = inlined_call_operand.hbm [shape: f32[512,128], index: 6, kind: input, shape index: {}]   ;;  %s1431_s7 = inlined_call_operand.vmem [shape: f32[1,128], index: 7, kind: input, shape index: {}]   ;;  %s1432_s8 = inlined_call_operand.hbm [shape: f32[8,256], index: 8, kind: output, shape index: {}]  }
   0x1   :  { %14 = vsyncpa [#allocation6], 0 }
   0x2   :  { %15 = vsyncpa [#allocation9], 0 }
   0x3   :  { %16 = vsyncpa [#allocation12], 0 }
   0x4   :  { %17 = vsyncpa [#allocation4], 0  ;;  %s1252_s27 = smov [#allocation5]   ;;  %s1253_s29 = smov [#allocation8]  }
   0x5   :  { %s34_s28 = sshll.u32 %s1252_s27, 4  ;;  %s53_s30 = sshll.u32 %s1253_s29, 4  ;;  %s35_s28 = int_to_ptr.vmem [resolvable:$true] %s34_s28  ;;  %s1310_s30 = int_to_ptr.vmem [resolvable:$true] %s53_s30 }
   0x6   :  { %s1088_s11 = scalar_lea.hbm %s1425_s1, 128 }
   0x7   :  { %p1089_p0 = scmp.ne.s32.totalorder %s1425_s1, %s1088_s11  ;;  %p1092_p1 = scmp.lt.u32.totalorder %s1088_s11, %s1425_s1 }
   0x9   :  { %p1094_p2 = pnand %p1092_p1, %p1089_p0 }
   0xb   :  { %1097 = shalt.err (!%p1094_p2)
}
   0xc   :  { %s1098_s16 = scalar_lea.vmem %s35_s28, 128  ;;  %p1103_p4 = scmp.lt.s32.totalorder %s35_s28, %s35_s28 }
   0xd   :  { %p1099_p3 = scmp.ne.s32.totalorder %s35_s28, %s1098_s16  ;;  %p1104_p5 = scmp.lt.s32.totalorder %s1098_s16, %s1098_s16 }
   0xf   :  { %p1105_p6 = por %p1104_p5, %p1103_p4 }
  0x11   :  { %p1106_p7 = pnand %p1105_p6, %p1099_p3 }
  0x13   :  { %1109 = shalt.err (!%p1106_p7)
}
  0x14   :  { %37 = dma.hbm_to_vmem [thread:$0]  %s1425_s1, 128, %s35_s28, [#allocation6]  }
  0x15   :  { %s1110_s21 = scalar_lea.hbm %s1427_s3, 8192 }
  0x16   :  { %p1111_p8 = scmp.ne.s32.totalorder %s1427_s3, %s1110_s21  ;;  %p1114_p9 = scmp.lt.u32.totalorder %s1110_s21, %s1427_s3 }
  0x18   :  { %p1116_p10 = pnand %p1114_p9, %p1111_p8 }
  0x1a   :  { %1119 = shalt.err (!%p1116_p10)
}
  0x1b   :  { %s1120_s26 = scalar_lea.vmem %s1310_s30, 8192  ;;  %p1125_p12 = scmp.lt.s32.totalorder %s1310_s30, %s1310_s30 }
  0x1c   :  { %p1121_p11 = scmp.ne.s32.totalorder %s1310_s30, %s1120_s26  ;;  %p1126_p13 = scmp.lt.s32.totalorder %s1120_s26, %s1120_s26 }
  0x1e   :  { %p1127_p0 = por %p1126_p13, %p1125_p12 }
  0x20   :  { %p1128_p1 = pnand %p1127_p0, %p1121_p11 }
  0x22   :  { %1131 = shalt.err (!%p1128_p1)
}
  0x23   :  { %s1254_s1 = smov 512   ;;  %s1255_s27 = smov 32  }
  0x24   :  { %59 = dma.hbm_to_vmem [thread:$0]  %s1427_s3, 8192, %s1310_s30, [#allocation9], %s1254_s1, %s1254_s1, %s1255_s27  }
  0x25   :  { %s1256_s9 = smov [#allocation2]   ;;  %s1257_s11 = smov [#allocation7]  }
  0x26   :  { %s24_s10 = sshll.u32 %s1256_s9, 4  ;;  %s44_s12 = sshll.u32 %s1257_s11, 4  ;;  %s25_s10 = int_to_ptr.vmem [resolvable:$true] %s24_s10  ;;  %s45_s12 = int_to_ptr.vmem [resolvable:$true] %s44_s12 }
  0x27   :  { %s1132_s15 = scalar_lea.hbm %s1424_s0, 128 }
  0x28   :  { %p1133_p2 = scmp.ne.s32.totalorder %s1424_s0, %s1132_s15  ;;  %p1136_p3 = scmp.lt.u32.totalorder %s1132_s15, %s1424_s0 }
  0x2a   :  { %p1138_p4 = pnand %p1136_p3, %p1133_p2 }
  0x2c   :  { %1141 = shalt.err (!%p1138_p4)
}
  0x2d   :  { %s1142_s3 = scalar_lea.vmem %s25_s10, 128  ;;  %p1147_p6 = scmp.lt.s32.totalorder %s25_s10, %s25_s10 }
  0x2e   :  { %p1143_p5 = scmp.ne.s32.totalorder %s25_s10, %s1142_s3  ;;  %p1148_p7 = scmp.lt.s32.totalorder %s1142_s3, %s1142_s3 }
  0x30   :  { %p1149_p8 = por %p1148_p7, %p1147_p6 }
  0x32   :  { %p1150_p9 = pnand %p1149_p8, %p1143_p5 }
  0x34   :  { %1153 = shalt.err (!%p1150_p9)
}
  0x35   :  { %27 = dma.hbm_to_vmem [thread:$0]  %s1424_s0, 128, %s25_s10, [#allocation3]  }
  0x36   :  { %s1154_s23 = scalar_lea.hbm %s1426_s2, 128 }
  0x37   :  { %p1155_p10 = scmp.ne.s32.totalorder %s1426_s2, %s1154_s23  ;;  %p1158_p11 = scmp.lt.u32.totalorder %s1154_s23, %s1426_s2 }
  0x39   :  { %p1160_p12 = pnand %p1158_p11, %p1155_p10 }
  0x3b   :  { %1163 = shalt.err (!%p1160_p12)
}
  0x3c   :  { %s1164_s29 = scalar_lea.vmem %s45_s12, 128  ;;  %p1169_p0 = scmp.lt.s32.totalorder %s45_s12, %s45_s12 }
  0x3d   :  { %p1165_p13 = scmp.ne.s32.totalorder %s45_s12, %s1164_s29  ;;  %p1170_p1 = scmp.lt.s32.totalorder %s1164_s29, %s1164_s29 }
  0x3f   :  { %p1171_p2 = por %p1170_p1, %p1169_p0 }
  0x41   :  { %p1172_p3 = pnand %p1171_p2, %p1165_p13 }
  0x43   :  { %1175 = shalt.err (!%p1172_p3)
}
  0x44   :  { %47 = dma.hbm_to_vmem [thread:$0]  %s1426_s2, 128, %s45_s12, [#allocation6]  }
  0x45   :  { %s1258_s10 = smov [#allocation10]   ;;  %s1259_s13 = smov [#allocation11]  }
  0x46   :  { %s65_s11 = sshll.u32 %s1258_s10, 4  ;;  %s79_s14 = sshll.u32 %s1259_s13, 4  ;;  %s66_s11 = int_to_ptr.vmem [resolvable:$true] %s65_s11  ;;  %s1368_s14 = int_to_ptr.vmem [resolvable:$true] %s79_s14 }
  0x47   :  { %s1176_s17 = scalar_lea.hbm %s1428_s4, 8192 }
  0x48   :  { %p1177_p4 = scmp.ne.s32.totalorder %s1428_s4, %s1176_s17  ;;  %p1180_p5 = scmp.lt.u32.totalorder %s1176_s17, %s1428_s4 }
  0x4a   :  { %p1182_p6 = pnand %p1180_p5, %p1177_p4 }
  0x4c   :  { %1185 = shalt.err (!%p1182_p6)
}
  0x4d   :  { %s1186_s2 = scalar_lea.vmem %s66_s11, 8192  ;;  %p1191_p8 = scmp.lt.s32.totalorder %s66_s11, %s66_s11 }
  0x4e   :  { %p1187_p7 = scmp.ne.s32.totalorder %s66_s11, %s1186_s2  ;;  %p1192_p9 = scmp.lt.s32.totalorder %s1186_s2, %s1186_s2 }
  0x50   :  { %p1193_p10 = por %p1192_p9, %p1191_p8 }
  0x52   :  { %p1194_p11 = pnand %p1193_p10, %p1187_p7 }
  0x54   :  { %1197 = shalt.err (!%p1194_p11)
}
  0x55   :  { %71 = dma.hbm_to_vmem [thread:$0]  %s1428_s4, 8192, %s66_s11, [#allocation9], %s1254_s1, %s1254_s1, %s1255_s27  }
  0x56   :  { %s1198_s23 = scalar_lea.hbm %s1430_s6, 8192 }
  0x57   :  { %p1199_p12 = scmp.ne.s32.totalorder %s1430_s6, %s1198_s23  ;;  %p1202_p13 = scmp.lt.u32.totalorder %s1198_s23, %s1430_s6 }
  0x59   :  { %p1204_p0 = pnand %p1202_p13, %p1199_p12 }
  0x5b   :  { %1207 = shalt.err (!%p1204_p0)
}
  0x5c   :  { %s1208_s29 = scalar_lea.vmem %s1368_s14, 8192  ;;  %p1213_p2 = scmp.lt.s32.totalorder %s1368_s14, %s1368_s14 }
  0x5d   :  { %p1209_p1 = scmp.ne.s32.totalorder %s1368_s14, %s1208_s29  ;;  %p1214_p3 = scmp.lt.s32.totalorder %s1208_s29, %s1208_s29 }
  0x5f   :  { %p1215_p4 = por %p1214_p3, %p1213_p2 }
  0x61   :  { %p1216_p5 = pnand %p1215_p4, %p1209_p1 }
  0x63   :  { %1219 = shalt.err (!%p1216_p5)
}
  0x64   :  { %s1260_s4 = smov 128   ;;  %s1261_s1 = smov 8  }
  0x65   :  { %85 = dma.hbm_to_vmem [thread:$0]  %s1430_s6, 8192, %s1368_s14, [#allocation12], %s1260_s4, %s1260_s4, %s1261_s1  }
  0x66   :  { %1242 = dma.done.wait [#allocation3], 128  }
  0x67   :  { %1243 = vsyncadd [#allocation3], 4294967168 }
  0x68   :  { %1244 = dma.done.wait [#allocation6], 256  }
  0x69   :  { %1245 = vsyncadd [#allocation6], 4294967040 }
  0x6a   :  { %1246 = dma.done.wait [#allocation9], 16384  }
  0x6b   :  { %1247 = vsyncadd [#allocation9], 4294950912 }
  0x6c   :  { %1248 = dma.done.wait [#allocation12], 8192  }
  0x6d   :  { %1249 = vsyncadd [#allocation12], 4294959104  ;;  %v1262_v0 = vmov 0.0   ;;  %v174_v1 = vld [vmem:[#allocation10 + $0x8] sm:$0xff]  ;;  %v176_v3 = vld [vmem:[#allocation10 + $0x18] sm:$0xff]  ;;  %s1263_s11 = smov 64  }
  0x6e   :  { %301 = vmatprep.mubr.f32.mxu0 %v1262_v0  ;;  %372 = vmatprep.mubr.f32.mxu1 %v1262_v0  ;;  %v178_v2 = vld [vmem:[#allocation10 + $0x28] sm:$0xff]  ;;  %v180_v5 = vld [vmem:[#allocation10 + $0x38] sm:$0xff]  ;;  %v173_v6 = vld [vmem:[#allocation10] sm:$0xff]  ;;  %s1264_s13 = smov [#allocation13]   ;;  %vm775_vm0 = vcmask 523264  }
  0x6f   :  { %v869_v4 = vpack.c.bf16 %v178_v2, %v174_v1  ;;  %v177_v7 = vld [vmem:[#allocation10 + $0x20] sm:$0xff]  ;;  %v901_v8 = vpack.c.bf16 %v180_v5, %v176_v3  ;;  %v175_v10 = vld [vmem:[#allocation10 + $0x10] sm:$0xff]  ;;  %v182_v12 = vld [vmem:[#allocation10 + $0x48] sm:$0xff]  ;;  %s786_s14 = sshll.u32 %s1264_s13, 4  ;;  %s787_s14 = int_to_ptr.vmem [resolvable:$true] %s786_s14 }
  0x70   :  { %v871_v9 = vpack.c.bf16 %v177_v7, %v173_v6  ;;  %v179_v11 = vld [vmem:[#allocation10 + $0x30] sm:$0xff]  ;;  %v186_v14 = vld [vmem:[#allocation10 + $0x68] sm:$0xff]  ;;  %v184_v15 = vld [vmem:[#allocation10 + $0x58] sm:$0xff]  ;;  %p1225_p7 = scmp.lt.s32.totalorder %s787_s14, %s787_s14 }
  0x71   :  { %870 = vmatprep.subr.bf16.mxu0 %v869_v4  ;;  %v903_v13 = vpack.c.bf16 %v179_v11, %v175_v10  ;;  %v188_v16 = vld [vmem:[#allocation10 + $0x78] sm:$0xff]  ;;  %902 = vmatprep.subr.bf16.mxu1 %v901_v8  ;;  %v873_v17 = vpack.c.bf16 %v186_v14, %v182_v12  ;;  %v181_v19 = vld [vmem:[#allocation10 + $0x40] sm:$0xff]  ;;  %v183_v21 = vld [vmem:[#allocation10 + $0x50] sm:$0xff] }
  0x72   :  { %872 = vmatpush1.bf16.msra.mxu0 %v871_v9  ;;  %v905_v18 = vpack.c.bf16 %v188_v16, %v184_v15  ;;  %v185_v20 = vld [vmem:[#allocation10 + $0x60] sm:$0xff]  ;;  %v187_v23 = vld [vmem:[#allocation10 + $0x70] sm:$0xff]  ;;  %v190_v24 = vld [vmem:[#allocation10 + $0x88] sm:$0xff] }
  0x73   :  { %904 = vmatpush1.bf16.msra.mxu1 %v903_v13  ;;  %v875_v22 = vpack.c.bf16 %v185_v20, %v181_v19  ;;  %v194_v25 = vld [vmem:[#allocation10 + $0xa8] sm:$0xff]  ;;  %874 = vmatprep.subr.bf16.mxu0 %v873_v17  ;;  %v907_v26 = vpack.c.bf16 %v187_v23, %v183_v21  ;;  %v192_v28 = vld [vmem:[#allocation10 + $0x98] sm:$0xff]  ;;  %v189_v30 = vld [vmem:[#allocation10 + $0x80] sm:$0xff] }
  0x74   :  { %906 = vmatprep.subr.bf16.mxu1 %v905_v18  ;;  %v877_v27 = vpack.c.bf16 %v194_v25, %v190_v24  ;;  %v196_v29 = vld [vmem:[#allocation10 + $0xb8] sm:$0xff]  ;;  %v193_v32 = vld [vmem:[#allocation10 + $0xa0] sm:$0xff]  ;;  %v191_v33 = vld [vmem:[#allocation10 + $0x90] sm:$0xff] }
  0x75   :  { %v909_v31 = vpack.c.bf16 %v196_v29, %v192_v28  ;;  %v195_v34 = vld [vmem:[#allocation10 + $0xb0] sm:$0xff]  ;;  %v879_v35 = vpack.c.bf16 %v193_v32, %v189_v30  ;;  %v198_v36 = vld [vmem:[#allocation10 + $0xc8] sm:$0xff]  ;;  %v200_v38 = vld [vmem:[#allocation10 + $0xd8] sm:$0xff] }
  0x76   :  { %876 = vmatpush1.bf16.msra.mxu0 %v875_v22  ;;  %v202_v37 = vld [vmem:[#allocation10 + $0xe8] sm:$0xff]  ;;  %v911_v39 = vpack.c.bf16 %v195_v34, %v191_v33  ;;  %v204_v41 = vld [vmem:[#allocation10 + $0xf8] sm:$0xff]  ;;  %v197_v42 = vld [vmem:[#allocation10 + $0xc0] sm:$0xff] }
  0x77   :  { %908 = vmatpush1.bf16.msra.mxu1 %v907_v26  ;;  %878 = vmatprep.subr.bf16.mxu0 %v877_v27  ;;  %v881_v40 = vpack.c.bf16 %v202_v37, %v198_v36  ;;  %v201_v43 = vld [vmem:[#allocation10 + $0xe0] sm:$0xff]  ;;  %v913_v44 = vpack.c.bf16 %v204_v41, %v200_v38  ;;  %v199_v45 = vld [vmem:[#allocation10 + $0xd0] sm:$0xff]  ;;  %v206_v47 = vld [vmem:[#allocation10 + $0x108] sm:$0xff] }
  0x78   :  { %910 = vmatprep.subr.bf16.mxu1 %v909_v31  ;;  %v203_v46 = vld [vmem:[#allocation10 + $0xf0] sm:$0xff]  ;;  %v210_v48 = vld [vmem:[#allocation10 + $0x128] sm:$0xff]  ;;  %v208_v49 = vld [vmem:[#allocation10 + $0x118] sm:$0xff]  ;;  %v883_v51 = vpack.c.bf16 %v201_v43, %v197_v42 }
  0x79   :  { %v212_v50 = vld [vmem:[#allocation10 + $0x138] sm:$0xff]  ;;  %v915_v52 = vpack.c.bf16 %v203_v46, %v199_v45  ;;  %v885_v53 = vpack.c.bf16 %v210_v48, %v206_v47  ;;  %v205_v54 = vld [vmem:[#allocation10 + $0x100] sm:$0xff]  ;;  %v207_v56 = vld [vmem:[#allocation10 + $0x110] sm:$0xff] }
  0x7a   :  { %880 = vmatpush1.bf16.msra.mxu0 %v879_v35  ;;  %v209_v55 = vld [vmem:[#allocation10 + $0x120] sm:$0xff]  ;;  %v917_v57 = vpack.c.bf16 %v212_v50, %v208_v49  ;;  %v211_v58 = vld [vmem:[#allocation10 + $0x130] sm:$0xff]  ;;  %v214_v59 = vld [vmem:[#allocation10 + $0x148] sm:$0xff] }
  0x7b   :  { %912 = vmatpush1.bf16.msra.mxu1 %v911_v39  ;;  %882 = vmatprep.subr.bf16.mxu0 %v881_v40  ;;  %v218_v60 = vld [vmem:[#allocation10 + $0x168] sm:$0xff]  ;;  %v216_v61 = vld [vmem:[#allocation10 + $0x158] sm:$0xff]  ;;  %v887_v63 = vpack.c.bf16 %v209_v55, %v205_v54  ;;  %v919_v1 = vpack.c.bf16 %v211_v58, %v207_v56  ;;  %v213_v3 = vld [vmem:[#allocation10 + $0x140] sm:$0xff] }
  0x7c   :  { %914 = vmatprep.subr.bf16.mxu1 %v913_v44  ;;  %v220_v62 = vld [vmem:[#allocation10 + $0x178] sm:$0xff]  ;;  %v889_v2 = vpack.c.bf16 %v218_v60, %v214_v59  ;;  %v217_v4 = vld [vmem:[#allocation10 + $0x160] sm:$0xff]  ;;  %v215_v5 = vld [vmem:[#allocation10 + $0x150] sm:$0xff] }
  0x7d   :  { %v921_v6 = vpack.c.bf16 %v220_v62, %v216_v61  ;;  %v219_v7 = vld [vmem:[#allocation10 + $0x170] sm:$0xff]  ;;  %v222_v8 = vld [vmem:[#allocation10 + $0x188] sm:$0xff]  ;;  %v224_v10 = vld [vmem:[#allocation10 + $0x198] sm:$0xff]  ;;  %v891_v12 = vpack.c.bf16 %v217_v4, %v213_v3 }
  0x7e   :  { %884 = vmatpush1.bf16.msra.mxu0 %v883_v51  ;;  %v226_v9 = vld [vmem:[#allocation10 + $0x1a8] sm:$0xff]  ;;  %v228_v11 = vld [vmem:[#allocation10 + $0x1b8] sm:$0xff]  ;;  %v923_v13 = vpack.c.bf16 %v219_v7, %v215_v5  ;;  %v221_v15 = vld [vmem:[#allocation10 + $0x180] sm:$0xff] }
  0x7f   :  { %916 = vmatpush1.bf16.msra.mxu1 %v915_v52  ;;  %886 = vmatprep.subr.bf16.mxu0 %v885_v53  ;;  %v893_v14 = vpack.c.bf16 %v226_v9, %v222_v8  ;;  %v225_v16 = vld [vmem:[#allocation10 + $0x1a0] sm:$0xff]  ;;  %v223_v17 = vld [vmem:[#allocation10 + $0x190] sm:$0xff]  ;;  %v925_v18 = vpack.c.bf16 %v228_v11, %v224_v10  ;;  %v230_v20 = vld [vmem:[#allocation10 + $0x1c8] sm:$0xff] }
  0x80   :  { %918 = vmatprep.subr.bf16.mxu1 %v917_v57  ;;  %v227_v19 = vld [vmem:[#allocation10 + $0x1b0] sm:$0xff]  ;;  %v234_v21 = vld [vmem:[#allocation10 + $0x1e8] sm:$0xff]  ;;  %v232_v22 = vld [vmem:[#allocation10 + $0x1d8] sm:$0xff]  ;;  %v895_v24 = vpack.c.bf16 %v225_v16, %v221_v15 }
  0x81   :  { %v236_v23 = vld [vmem:[#allocation10 + $0x1f8] sm:$0xff]  ;;  %v927_v25 = vpack.c.bf16 %v227_v19, %v223_v17  ;;  %v897_v26 = vpack.c.bf16 %v234_v21, %v230_v20  ;;  %v229_v27 = vld [vmem:[#allocation10 + $0x1c0] sm:$0xff]  ;;  %v231_v29 = vld [vmem:[#allocation10 + $0x1d0] sm:$0xff] }
  0x82   :  { %888 = vmatpush1.bf16.msra.mxu0 %v887_v63  ;;  %v233_v28 = vld [vmem:[#allocation10 + $0x1e0] sm:$0xff]  ;;  %v929_v30 = vpack.c.bf16 %v236_v23, %v232_v22  ;;  %v235_v31 = vld [vmem:[#allocation10 + $0x1f0] sm:$0xff]  ;;  %v110_v32 = vld [vmem:[#allocation8 + $0x8] sm:$0xff] }
  0x83   :  { %920 = vmatpush1.bf16.msra.mxu1 %v919_v1  ;;  %890 = vmatprep.subr.bf16.mxu0 %v889_v2  ;;  %v114_v33 = vld [vmem:[#allocation8 + $0x28] sm:$0xff]  ;;  %v112_v34 = vld [vmem:[#allocation8 + $0x18] sm:$0xff]  ;;  %v899_v36 = vpack.c.bf16 %v233_v28, %v229_v27  ;;  %v931_v37 = vpack.c.bf16 %v235_v31, %v231_v29  ;;  %v109_v39 = vld [vmem:[#allocation8] sm:$0xff] }
  0x84   :  { %922 = vmatprep.subr.bf16.mxu1 %v921_v6  ;;  %v116_v35 = vld [vmem:[#allocation8 + $0x38] sm:$0xff]  ;;  %v933_v38 = vpack.c.bf16 %v114_v33, %v110_v32  ;;  %v113_v40 = vld [vmem:[#allocation8 + $0x20] sm:$0xff]  ;;  %v111_v41 = vld [vmem:[#allocation8 + $0x10] sm:$0xff] }
  0x85   :  { %v965_v42 = vpack.c.bf16 %v116_v35, %v112_v34  ;;  %v115_v43 = vld [vmem:[#allocation8 + $0x30] sm:$0xff]  ;;  %v118_v44 = vld [vmem:[#allocation8 + $0x48] sm:$0xff]  ;;  %v120_v46 = vld [vmem:[#allocation8 + $0x58] sm:$0xff]  ;;  %v935_v49 = vpack.c.bf16 %v113_v40, %v109_v39 }
  0x86   :  { %892 = vmatpush1.bf16.msra.mxu0 %v891_v12  ;;  %v122_v45 = vld [vmem:[#allocation8 + $0x68] sm:$0xff]  ;;  %v124_v47 = vld [vmem:[#allocation8 + $0x78] sm:$0xff]  ;;  %v107_v48 = vld [vmem:[#allocation5] sm:$0xff]  ;;  %v967_v50 = vpack.c.bf16 %v115_v43, %v111_v41 }
  0x87   :  { %924 = vmatpush1.bf16.msra.mxu1 %v923_v13  ;;  %894 = vmatprep.subr.bf16.mxu0 %v893_v14  ;;  %v937_v51 = vpack.c.bf16 %v122_v45, %v118_v44  ;;  %v117_v52 = vld [vmem:[#allocation8 + $0x40] sm:$0xff]  ;;  %v119_v54 = vld [vmem:[#allocation8 + $0x50] sm:$0xff]  ;;  %v969_v55 = vpack.c.bf16 %v124_v47, %v120_v46  ;;  %v126_v57 = vld [vmem:[#allocation8 + $0x88] sm:$0xff] }
  0x88   :  { %926 = vmatprep.subr.bf16.mxu1 %v925_v18  ;;  %v121_v53 = vld [vmem:[#allocation8 + $0x60] sm:$0xff]  ;;  %v123_v56 = vld [vmem:[#allocation8 + $0x70] sm:$0xff]  ;;  %v130_v58 = vld [vmem:[#allocation8 + $0xa8] sm:$0xff] }
  0x89   :  { %v128_v59 = vld [vmem:[#allocation8 + $0x98] sm:$0xff]  ;;  %v939_v61 = vpack.c.bf16 %v121_v53, %v117_v52  ;;  %v971_v62 = vpack.c.bf16 %v123_v56, %v119_v54  ;;  %v941_v63 = vpack.c.bf16 %v130_v58, %v126_v57  ;;  %v125_v1 = vld [vmem:[#allocation8 + $0x80] sm:$0xff]  ;;  %v127_v3 = vld [vmem:[#allocation8 + $0x90] sm:$0xff] }
  0x8a   :  { %896 = vmatpush1.bf16.msra.mxu0 %v895_v24  ;;  %v132_v60 = vld [vmem:[#allocation8 + $0xb8] sm:$0xff]  ;;  %v129_v2 = vld [vmem:[#allocation8 + $0xa0] sm:$0xff]  ;;  %v131_v5 = vld [vmem:[#allocation8 + $0xb0] sm:$0xff] }
  0x8b   :  { %928 = vmatpush1.bf16.msra.mxu1 %v927_v25  ;;  %898 = vmatprep.subr.bf16.mxu0 %v897_v26  ;;  %v973_v4 = vpack.c.bf16 %v132_v60, %v128_v59  ;;  %v134_v6 = vld [vmem:[#allocation8 + $0xc8] sm:$0xff]  ;;  %v136_v8 = vld [vmem:[#allocation8 + $0xd8] sm:$0xff]  ;;  %v943_v10 = vpack.c.bf16 %v129_v2, %v125_v1  ;;  %v975_v11 = vpack.c.bf16 %v131_v5, %v127_v3  ;;  %v133_v13 = vld [vmem:[#allocation8 + $0xc0] sm:$0xff] }
  0x8c   :  { %930 = vmatprep.subr.bf16.mxu1 %v929_v30  ;;  %v138_v7 = vld [vmem:[#allocation8 + $0xe8] sm:$0xff]  ;;  %v140_v9 = vld [vmem:[#allocation8 + $0xf8] sm:$0xff]  ;;  %v137_v14 = vld [vmem:[#allocation8 + $0xe0] sm:$0xff] }
  0x8d   :  { %v945_v12 = vpack.c.bf16 %v138_v7, %v134_v6  ;;  %v135_v15 = vld [vmem:[#allocation8 + $0xd0] sm:$0xff]  ;;  %v977_v16 = vpack.c.bf16 %v140_v9, %v136_v8  ;;  %v142_v18 = vld [vmem:[#allocation8 + $0x108] sm:$0xff]  ;;  %v144_v20 = vld [vmem:[#allocation8 + $0x118] sm:$0xff]  ;;  %v947_v22 = vpack.c.bf16 %v137_v14, %v133_v13 }
  0x8e   :  { %900 = vmatpush1.bf16.msra.mxu0 %v899_v36  ;;  %v139_v17 = vld [vmem:[#allocation8 + $0xf0] sm:$0xff]  ;;  %v146_v19 = vld [vmem:[#allocation8 + $0x128] sm:$0xff]  ;;  %v148_v21 = vld [vmem:[#allocation8 + $0x138] sm:$0xff] }
  0x8f   :  { %932 = vmatpush1.bf16.msra.mxu1 %v931_v37  ;;  %934 = vmatprep.subr.bf16.mxu0 %v933_v38  ;;  %v949_v23 = vpack.c.bf16 %v146_v19, %v142_v18  ;;  %v141_v24 = vld [vmem:[#allocation8 + $0x100] sm:$0xff]  ;;  %v143_v26 = vld [vmem:[#allocation8 + $0x110] sm:$0xff]  ;;  %v981_v27 = vpack.c.bf16 %v148_v21, %v144_v20  ;;  %v150_v29 = vld [vmem:[#allocation8 + $0x148] sm:$0xff] }
  0x90   :  { %966 = vmatprep.subr.bf16.mxu1 %v965_v42  ;;  %v145_v25 = vld [vmem:[#allocation8 + $0x120] sm:$0xff]  ;;  %v147_v28 = vld [vmem:[#allocation8 + $0x130] sm:$0xff]  ;;  %v154_v30 = vld [vmem:[#allocation8 + $0x168] sm:$0xff] }
  0x91   :  { %302 = vmatmul.mubr.f32.vlgmr.msra.gmra.mrb[0].mxu0 %v107_v48  ;;  %v152_v31 = vld [vmem:[#allocation8 + $0x158] sm:$0xff]  ;;  %v951_v33 = vpack.c.bf16 %v145_v25, %v141_v24  ;;  %v983_v34 = vpack.c.bf16 %v147_v28, %v143_v26  ;;  %v953_v35 = vpack.c.bf16 %v154_v30, %v150_v29  ;;  %v149_v36 = vld [vmem:[#allocation8 + $0x140] sm:$0xff]  ;;  %v151_v38 = vld [vmem:[#allocation8 + $0x150] sm:$0xff] }
  0x92   :  { %373 = vmatmul.mubr.f32.vlgmr.msra.gmra.mrb[0].mxu1 %v107_v48  ;;  %936 = vmatpush1.bf16.msra.mxu0 %v935_v49  ;;  %v156_v32 = vld [vmem:[#allocation8 + $0x178] sm:$0xff]  ;;  %v153_v37 = vld [vmem:[#allocation8 + $0x160] sm:$0xff]  ;;  %v155_v40 = vld [vmem:[#allocation8 + $0x170] sm:$0xff] }
  0x93   :  { %968 = vmatpush1.bf16.msra.mxu1 %v967_v50  ;;  %938 = vmatprep.subr.bf16.mxu0 %v937_v51  ;;  %v985_v39 = vpack.c.bf16 %v156_v32, %v152_v31  ;;  %v158_v41 = vld [vmem:[#allocation8 + $0x188] sm:$0xff]  ;;  %v160_v43 = vld [vmem:[#allocation8 + $0x198] sm:$0xff]  ;;  %v955_v45 = vpack.c.bf16 %v153_v37, %v149_v36  ;;  %v987_v46 = vpack.c.bf16 %v155_v40, %v151_v38  ;;  %v157_v48 = vld [vmem:[#allocation8 + $0x180] sm:$0xff] }
  0x94   :  { %970 = vmatprep.subr.bf16.mxu1 %v969_v55  ;;  %443 = vmatprep.mubr.f32.mxu0 %v1262_v0  ;;  %v162_v42 = vld [vmem:[#allocation8 + $0x1a8] sm:$0xff]  ;;  %v164_v44 = vld [vmem:[#allocation8 + $0x1b8] sm:$0xff]  ;;  %v161_v49 = vld [vmem:[#allocation8 + $0x1a0] sm:$0xff] }
  0x95   :  { %514 = vmatprep.mubr.f32.mxu1 %v1262_v0  ;;  %v979_v0 = vpack.c.bf16 %v139_v17, %v135_v15  ;;  %v957_v47 = vpack.c.bf16 %v162_v42, %v158_v41  ;;  %v159_v50 = vld [vmem:[#allocation8 + $0x190] sm:$0xff]  ;;  %v989_v51 = vpack.c.bf16 %v164_v44, %v160_v43  ;;  %v166_v53 = vld [vmem:[#allocation8 + $0x1c8] sm:$0xff]  ;;  %v168_v55 = vld [vmem:[#allocation8 + $0x1d8] sm:$0xff]  ;;  %v959_v57 = vpack.c.bf16 %v161_v49, %v157_v48 }
  0x96   :  { %940 = vmatpush1.bf16.msra.mxu0 %v939_v61  ;;  %v163_v52 = vld [vmem:[#allocation8 + $0x1b0] sm:$0xff]  ;;  %v170_v54 = vld [vmem:[#allocation8 + $0x1e8] sm:$0xff]  ;;  %v172_v56 = vld [vmem:[#allocation8 + $0x1f8] sm:$0xff] }
  0x97   :  { %972 = vmatpush1.bf16.msra.mxu1 %v971_v62  ;;  %942 = vmatprep.subr.bf16.mxu0 %v941_v63  ;;  %v991_v58 = vpack.c.bf16 %v163_v52, %v159_v50  ;;  %v961_v59 = vpack.c.bf16 %v170_v54, %v166_v53  ;;  %v165_v60 = vld [vmem:[#allocation8 + $0x1c0] sm:$0xff]  ;;  %v167_v62 = vld [vmem:[#allocation8 + $0x1d0] sm:$0xff]  ;;  %v993_v63 = vpack.c.bf16 %v172_v56, %v168_v55  ;;  %v568_v3 = vld [vmem:[#allocation11 + $0x88] sm:$0xff] }
  0x98   :  { %974 = vmatprep.subr.bf16.mxu1 %v973_v4  ;;  %v169_v61 = vld [vmem:[#allocation8 + $0x1e0] sm:$0xff]  ;;  %v171_v1 = vld [vmem:[#allocation8 + $0x1f0] sm:$0xff]  ;;  %v600_v5 = vld [vmem:[#allocation11 + $0x188] sm:$0xff] }
  0x99   :  { %v567_v2 = vld [vmem:[#allocation11 + $0x80] sm:$0xff]  ;;  %v963_v6 = vpack.c.bf16 %v169_v61, %v165_v60  ;;  %v995_v7 = vpack.c.bf16 %v171_v1, %v167_v62  ;;  %v584_v13 = vld [vmem:[#allocation11 + $0x108] sm:$0xff]  ;;  %v569_v14 = vld [vmem:[#allocation11 + $0x90] sm:$0xff] }
  0x9a   :  { %944 = vmatpush1.bf16.msra.mxu0 %v943_v10  ;;  %v599_v4 = vld [vmem:[#allocation11 + $0x180] sm:$0xff]  ;;  %v997_v8 = vpack.c.bf16 %v568_v3, %v567_v2  ;;  %v552_v10 = vld [vmem:[#allocation11 + $0x8] sm:$0xff]  ;;  %v570_v15 = vld [vmem:[#allocation11 + $0x98] sm:$0xff] }
  0x9b   :  { %976 = vmatpush1.bf16.msra.mxu1 %v975_v11  ;;  %946 = vmatprep.subr.bf16.mxu0 %v945_v12  ;;  %v551_v9 = vld [vmem:[#allocation11] sm:$0xff]  ;;  %v1029_v12 = vpack.c.bf16 %v600_v5, %v599_v4  ;;  %v602_v17 = vld [vmem:[#allocation11 + $0x198] sm:$0xff]  ;;  %v106_v18 = vld [vmem:[#allocation2] sm:$0xff]  ;;  %v1001_v21 = vpack.c.bf16 %v570_v15, %v569_v14 }
  0x9c   :  { %978 = vmatprep.subr.bf16.mxu1 %v977_v16  ;;  %v583_v11 = vld [vmem:[#allocation11 + $0x100] sm:$0xff]  ;;  %v601_v16 = vld [vmem:[#allocation11 + $0x190] sm:$0xff]  ;;  %v999_v19 = vpack.c.bf16 %v552_v10, %v551_v9  ;;  %v586_v25 = vld [vmem:[#allocation11 + $0x118] sm:$0xff] }
  0x9d   :  { %v1031_v20 = vpack.c.bf16 %v584_v13, %v583_v11  ;;  %v1033_v24 = vpack.c.bf16 %v602_v17, %v601_v16  ;;  %v571_v26 = vld [vmem:[#allocation11 + $0xa0] sm:$0xff]  ;;  %v604_v29 = vld [vmem:[#allocation11 + $0x1a8] sm:$0xff]  ;;  %v573_v38 = vld [vmem:[#allocation11 + $0xb0] sm:$0xff] }
  0x9e   :  { %948 = vmatpush1.bf16.msra.mxu0 %v947_v22  ;;  %v553_v22 = vld [vmem:[#allocation11 + $0x10] sm:$0xff]  ;;  %v603_v28 = vld [vmem:[#allocation11 + $0x1a0] sm:$0xff]  ;;  %v588_v37 = vld [vmem:[#allocation11 + $0x128] sm:$0xff] }
  0x9f   :  { %980 = vmatpush1.bf16.msra.mxu1 %v979_v0  ;;  %950 = vmatprep.subr.bf16.mxu0 %v949_v23  ;;  %v554_v0 = vld [vmem:[#allocation11 + $0x18] sm:$0xff]  ;;  %v585_v23 = vld [vmem:[#allocation11 + $0x110] sm:$0xff]  ;;  %v1037_v36 = vpack.c.bf16 %v604_v29, %v603_v28  ;;  %v575_v52 = vld [vmem:[#allocation11 + $0xc0] sm:$0xff] }
  0xa0   :  { %982 = vmatprep.subr.bf16.mxu1 %v981_v27  ;;  %v572_v27 = vld [vmem:[#allocation11 + $0xa8] sm:$0xff]  ;;  %v1003_v30 = vpack.c.bf16 %v554_v0, %v553_v22  ;;  %v1035_v31 = vpack.c.bf16 %v586_v25, %v585_v23  ;;  %v605_v40 = vld [vmem:[#allocation11 + $0x1b0] sm:$0xff]  ;;  %v606_v41 = vld [vmem:[#allocation11 + $0x1b8] sm:$0xff] }
  0xa1   :  { %v1005_v32 = vpack.c.bf16 %v572_v27, %v571_v26  ;;  %v589_v48 = vld [vmem:[#allocation11 + $0x130] sm:$0xff]  ;;  %v590_v49 = vld [vmem:[#allocation11 + $0x138] sm:$0xff]  ;;  %v576_v53 = vld [vmem:[#allocation11 + $0xc8] sm:$0xff] }
  0xa2   :  { %952 = vmatpush1.bf16.msra.mxu0 %v951_v33  ;;  %v555_v33 = vld [vmem:[#allocation11 + $0x20] sm:$0xff]  ;;  %v1013_v55 = vpack.c.bf16 %v576_v53, %v575_v52  ;;  %v608_v56 = vld [vmem:[#allocation11 + $0x1c8] sm:$0xff]  ;;  %v577_v1 = vld [vmem:[#allocation11 + $0xd0] sm:$0xff] }
  0xa3   :  { %984 = vmatpush1.bf16.msra.mxu1 %v983_v34  ;;  %954 = vmatprep.subr.bf16.mxu0 %v953_v35  ;;  %v556_v34 = vld [vmem:[#allocation11 + $0x28] sm:$0xff]  ;;  %v587_v35 = vld [vmem:[#allocation11 + $0x120] sm:$0xff]  ;;  %v578_v2 = vld [vmem:[#allocation11 + $0xd8] sm:$0xff] }
  0xa4   :  { %986 = vmatprep.subr.bf16.mxu1 %v985_v39  ;;  %v574_v39 = vld [vmem:[#allocation11 + $0xb8] sm:$0xff]  ;;  %v1007_v42 = vpack.c.bf16 %v556_v34, %v555_v33  ;;  %v1039_v43 = vpack.c.bf16 %v588_v37, %v587_v35  ;;  %v607_v54 = vld [vmem:[#allocation11 + $0x1c0] sm:$0xff]  ;;  %v592_v62 = vld [vmem:[#allocation11 + $0x148] sm:$0xff]  ;;  %v1017_v4 = vpack.c.bf16 %v578_v2, %v577_v1 }
  0xa5   :  { %v1009_v44 = vpack.c.bf16 %v574_v39, %v573_v38  ;;  %v591_v60 = vld [vmem:[#allocation11 + $0x140] sm:$0xff]  ;;  %v609_v3 = vld [vmem:[#allocation11 + $0x1d0] sm:$0xff]  ;;  %v610_v5 = vld [vmem:[#allocation11 + $0x1d8] sm:$0xff] }
  0xa6   :  { %956 = vmatpush1.bf16.msra.mxu0 %v955_v45  ;;  %v557_v45 = vld [vmem:[#allocation11 + $0x30] sm:$0xff]  ;;  %v594_v11 = vld [vmem:[#allocation11 + $0x158] sm:$0xff]  ;;  %v579_v13 = vld [vmem:[#allocation11 + $0xe0] sm:$0xff] }
  0xa7   :  { %988 = vmatpush1.bf16.msra.mxu1 %v987_v46  ;;  %958 = vmatprep.subr.bf16.mxu0 %v957_v47  ;;  %v558_v46 = vld [vmem:[#allocation11 + $0x38] sm:$0xff]  ;;  %v1041_v47 = vpack.c.bf16 %v606_v41, %v605_v40  ;;  %v593_v10 = vld [vmem:[#allocation11 + $0x150] sm:$0xff]  ;;  %v580_v14 = vld [vmem:[#allocation11 + $0xe8] sm:$0xff] }
  0xa8   :  { %990 = vmatprep.subr.bf16.mxu1 %v989_v51  ;;  %v1011_v50 = vpack.c.bf16 %v558_v46, %v557_v45  ;;  %v1043_v51 = vpack.c.bf16 %v590_v49, %v589_v48  ;;  %v611_v15 = vld [vmem:[#allocation11 + $0x1e0] sm:$0xff]  ;;  %v1021_v16 = vpack.c.bf16 %v580_v14, %v579_v13  ;;  %v612_v17 = vld [vmem:[#allocation11 + $0x1e8] sm:$0xff]  ;;  %v581_v23 = vld [vmem:[#allocation11 + $0xf0] sm:$0xff] }
  0xa9   :  { %v595_v22 = vld [vmem:[#allocation11 + $0x160] sm:$0xff]  ;;  %v596_v0 = vld [vmem:[#allocation11 + $0x168] sm:$0xff]  ;;  %v582_v25 = vld [vmem:[#allocation11 + $0xf8] sm:$0xff] }
  0xaa   :  { %960 = vmatpush1.bf16.msra.mxu0 %v959_v57  ;;  %v1045_v57 = vpack.c.bf16 %v608_v56, %v607_v54  ;;  %v613_v26 = vld [vmem:[#allocation11 + $0x1f0] sm:$0xff]  ;;  %v614_v27 = vld [vmem:[#allocation11 + $0x1f8] sm:$0xff]  ;;  %v1025_v28 = vpack.c.bf16 %v582_v25, %v581_v23  ;;  %v521_v39 = vld [vmem:[%s1429_s5] sm:$0xf] }
  0xab   :  { %992 = vmatpush1.bf16.msra.mxu1 %v991_v58  ;;  %962 = vmatprep.subr.bf16.mxu0 %v961_v59  ;;  %v559_v58 = vld [vmem:[#allocation11 + $0x40] sm:$0xff]  ;;  %v560_v59 = vld [vmem:[#allocation11 + $0x48] sm:$0xff]  ;;  %v1057_v29 = vpack.c.bf16 %v614_v27, %v613_v26  ;;  %v598_v34 = vld [vmem:[#allocation11 + $0x178] sm:$0xff] }
  0xac   :  { %994 = vmatprep.subr.bf16.mxu1 %v993_v63  ;;  %v1015_v61 = vpack.c.bf16 %v560_v59, %v559_v58  ;;  %v1047_v63 = vpack.c.bf16 %v592_v62, %v591_v60 }
  0xae   :  { %964 = vmatpush1.bf16.msra.mxu0 %v963_v6  ;;  %v561_v6 = vld [vmem:[#allocation11 + $0x50] sm:$0xff] }
  0xaf   :  { %996 = vmatpush1.bf16.msra.mxu1 %v995_v7  ;;  %998 = vmatprep.subr.bf16.mxu0 %v997_v8  ;;  %v562_v7 = vld [vmem:[#allocation11 + $0x58] sm:$0xff]  ;;  %v1049_v8 = vpack.c.bf16 %v610_v5, %v609_v3 }
  0xb0   :  { %1030 = vmatprep.subr.bf16.mxu1 %v1029_v12  ;;  %v1019_v9 = vpack.c.bf16 %v562_v7, %v561_v6  ;;  %v1051_v12 = vpack.c.bf16 %v594_v11, %v593_v10 }
  0xb1   :  { %444 = vmatmul.mubr.f32.vlgmr.msra.gmra.mrb[0].mxu0 %v106_v18 }
  0xb2   :  { %515 = vmatmul.mubr.f32.vlgmr.msra.gmra.mrb[0].mxu1 %v106_v18  ;;  %1000 = vmatpush3.bf16.msra.mxu0 %v999_v19  ;;  %v563_v18 = vld [vmem:[#allocation11 + $0x60] sm:$0xff]  ;;  %v564_v19 = vld [vmem:[#allocation11 + $0x68] sm:$0xff] }
  0xb3   :  { %1032 = vmatpush3.bf16.msra.mxu1 %v1031_v20  ;;  %1002 = vmatprep.subr.bf16.mxu0 %v1001_v21  ;;  %v1053_v20 = vpack.c.bf16 %v612_v17, %v611_v15  ;;  %v1023_v21 = vpack.c.bf16 %v564_v19, %v563_v18 }
  0xb4   :  { %1034 = vmatprep.subr.bf16.mxu1 %v1033_v24  ;;  %v1055_v24 = vpack.c.bf16 %v596_v0, %v595_v22 }
  0xb6   :  { %1004 = vmatpush3.bf16.msra.mxu0 %v1003_v30  ;;  %v565_v30 = vld [vmem:[#allocation11 + $0x70] sm:$0xff] }
  0xb7   :  { %1036 = vmatpush3.bf16.msra.mxu1 %v1035_v31  ;;  %1006 = vmatprep.subr.bf16.mxu0 %v1005_v32  ;;  %v566_v31 = vld [vmem:[#allocation11 + $0x78] sm:$0xff]  ;;  %v597_v32 = vld [vmem:[#allocation11 + $0x170] sm:$0xff] }
  0xb8   :  { %1038 = vmatprep.subr.bf16.mxu1 %v1037_v36  ;;  %v1027_v33 = vpack.c.bf16 %v566_v31, %v565_v30  ;;  %v1059_v35 = vpack.c.bf16 %v598_v34, %v597_v32  ;;  %v523_v36 = vlaneseq }
  0xba   :  { %1008 = vmatpush3.bf16.msra.mxu0 %v1007_v42  ;;  %v524_v37 = vshrl.u32 %v523_v36, 7 }
  0xbb   :  { %1040 = vmatpush3.bf16.msra.mxu1 %v1039_v43  ;;  %1010 = vmatprep.subr.bf16.mxu0 %v1009_v44 }
  0xbc   :  { %1042 = vmatprep.subr.bf16.mxu1 %v1041_v47  ;;  %v525_v38 = vsub.s32 0, %v524_v37  ;;  %v529_v40 = vsub.s32 1, %v524_v37  ;;  %v533_v41 = vsub.s32 2, %v524_v37  ;;  %v537_v42 = vsub.s32 3, %v524_v37 }
  0xbe   :  { %1012 = vmatpush3.bf16.msra.mxu0 %v1011_v50  ;;  %v526_v43 = vrot.slane %v521_v39, %v525_v38  ;;  %v530_v44 = vrot.slane %v521_v39, %v529_v40  ;;  %v534_v45 = vrot.slane %v521_v39, %v533_v41  ;;  %v538_v46 = vrot.slane %v521_v39, %v537_v42 }
  0xbf   :  { %1044 = vmatpush3.bf16.msra.mxu1 %v1043_v51  ;;  %1014 = vmatprep.subr.bf16.mxu0 %v1013_v55 }
  0xc0   :  { %1046 = vmatprep.subr.bf16.mxu1 %v1045_v57 }
  0xc2   :  { %1016 = vmatpush3.bf16.msra.mxu0 %v1015_v61  ;;  %v798_v61 = vld [vmem:[%s1431_s7] ss:$0 sm:$0xff]  ;;  %s1220_s7 = scalar_lea.vmem %s787_s14, 256 }
  0xc3   :  { %1048 = vmatpush3.bf16.msra.mxu1 %v1047_v63  ;;  %1018 = vmatprep.subr.bf16.mxu0 %v1017_v4  ;;  %p1221_p6 = scmp.ne.s32.totalorder %s787_s14, %s1220_s7  ;;  %p1226_p8 = scmp.lt.s32.totalorder %s1220_s7, %s1220_s7 }
  0xc4   :  { %1050 = vmatprep.subr.bf16.mxu1 %v1049_v8  ;;  %v108_v8 = vld [vmem:[#allocation7] sm:$0xff] }
  0xc5   :  { %p1227_p9 = por %p1226_p8, %p1225_p7 }
  0xc6   :  { %1020 = vmatpush3.bf16.msra.mxu0 %v1019_v9 }
  0xc7   :  { %1052 = vmatpush3.bf16.msra.mxu1 %v1051_v12  ;;  %1022 = vmatprep.subr.bf16.mxu0 %v1021_v16  ;;  %p1228_p10 = pnand %p1227_p9, %p1221_p6 }
  0xc8   :  { %1054 = vmatprep.subr.bf16.mxu1 %v1053_v20 }
  0xca   :  { %1024 = vmatpush3.bf16.msra.mxu0 %v1023_v21 }
  0xcb   :  { %1056 = vmatpush3.bf16.msra.mxu1 %v1055_v24  ;;  %1026 = vmatprep.subr.bf16.mxu0 %v1025_v28 }
  0xcc   :  { %1058 = vmatprep.subr.bf16.mxu1 %v1057_v29 }
  0xce   :  { %1028 = vmatpush3.bf16.msra.mxu0 %v1027_v33 }
  0xcf   :  { %1060 = vmatpush3.bf16.msra.mxu1 %v1059_v35 }
 0x184   :  { %v445_v47 = vpop.f32.mrb[0].mxu0 }
 0x185   :  { %v543_v48 = vadd.f32 %v526_v43, %v445_v47  ;;  %v516_v49 = vpop.f32.mrb[0].mxu1  ;;  %v447_v50 = vpop.f32.mrb[1].mxu0 }
 0x186   :  { %v544_v51 = vadd.f32 %v530_v44, %v447_v50  ;;  %v518_v52 = vpop.f32.mrb[1].mxu1  ;;  %v545_v53 = vadd.f32 %v534_v45, %v516_v49 }
 0x187   :  { %v546_v54 = vadd.f32 %v538_v46, %v518_v52  ;;  %1078 = vtanh.f32 %v543_v48 }
 0x188   :  { %1080 = vtanh.f32 %v544_v51 }
 0x189   :  { %1082 = vtanh.f32 %v546_v54 }
 0x18a   :  { %1084 = vtanh.f32 %v545_v53 }
 0x191   :  { %v1079_v55 = vpop.eup %1078 }
 0x192   :  { %v1081_v56 = vpop.eup %1080 }
 0x193   :  { %v1083_v57 = vpop.eup %1082  ;;  %686 = vmatprep.mubr.f32.mxu0 %v1081_v56 }
 0x194   :  { %v1085_v58 = vpop.eup %1084  ;;  %756 = vmatprep.mubr.f32.mxu1 %v1083_v57  ;;  %687 = vmatmul.mubr.f32.vlgmr.msra.gmra.mrb[2].mxu0 %v1079_v55 }
 0x195   :  { %757 = vmatmul.mubr.f32.vlgmr.msra.gmra.mrb[2].mxu1 %v1085_v58 }
 0x267   :  { %v831_v59 = vpop.f32.mrb[2].mxu0 }
 0x268   :  { %v866_v60 = vpop.f32.mrb[2].mxu1  ;;  %v832_v62 = vpop.f32.mrb[3].mxu0 }
 0x269   :  { %v833_v63 = vadd.f32 %v832_v62, %v831_v59  ;;  %v867_v1 = vpop.f32.mrb[3].mxu1 }
 0x26a   :  { %v868_v2 = vadd.f32 %v867_v1, %v866_v60 }
 0x26b   :  { %v689_v3 = vadd.f32 %v833_v63, %v798_v61 }
 0x26d   :  { %v759_v4 = vadd.f32 %v868_v2, %v689_v3 }
 0x26f   :  { %v762_v5 = vmul.f32 0.5, %v759_v4 }
 0x271   :  { %v763_v6 = vmul.f32 1.442695, %v762_v5 }
 0x273   :  { %1086 = vpow2.f32 %v763_v6 }
 0x27d   :  { %v1087_v7 = vpop.eup %1086 }
 0x27e   :  { %766 = vrot.lane.b32.xlu0 %v1087_v7, %s1263_s11 }
 0x282   :  { %772 = vrot.lane.b32.xlu0 %v759_v4, %s1263_s11 }
 0x2f0   :  { %v767_v9 = vpop.permute.xlu0 %766 }
 0x2f1   :  { %v769_v10 = vmul.f32 %v767_v9, %v108_v8 }
 0x2f3   :  { %v770_v11 = vadd.f32 %v769_v10, %v759_v4 }
 0x2f4   :  { %v773_v12 = vpop.permute.xlu0 %772 }
 0x2f5   :  { %v776_v13 = vsel %vm775_vm0, %v770_v11, %v773_v12  ;;  %v777_v14 = vsel %vm775_vm0, %v773_v12, 0.0 }
 0x2f6   :  { %778 = vst [vmem:[#allocation13] sm:$0xff] %v776_v13  ;;  %779 = vst [vmem:[#allocation13 + $0x8] sm:$0xff] %v777_v14 }
 0x2f7   :  { %1231 = shalt.err (!%p1228_p10)
}
 0x2f8   :  { %s1232_s17 = scalar_lea.hbm %s1432_s8, 256 }
 0x2f9   :  { %p1233_p11 = scmp.ne.s32.totalorder %s1432_s8, %s1232_s17  ;;  %p1236_p12 = scmp.lt.u32.totalorder %s1232_s17, %s1432_s8 }
 0x2fb   :  { %p1238_p13 = pnand %p1236_p12, %p1233_p11 }
 0x2fd   :  { %1241 = shalt.err (!%p1238_p13)
}
 0x2fe   :  { %789 = dma.vmem_to_hbm [thread:$0]  %s787_s14, 256, %s1432_s8, [#allocation4]  }
 0x2ff   :  { %1250 = dma.done.wait [#allocation4], 256  }
 0x300   :  { %1251 = vsyncadd [#allocation4], 4294967040 }
 0x301   :  { %793 = vsyncpa [#allocation3], 1 }
 0x302   :  { %794 = vsyncpa [#allocation6], 1 }
 0x303   :  { %795 = vsyncpa [#allocation9], 1 }
 0x304   :  { %796 = vsyncpa [#allocation12], 1 }
 0x305   :  { %797 = vsyncpa [#allocation4], 1 }

</bundles_post_ra>
